<compile_context>
chip_gen: v5e
topology: v5e:2x2
jax: 0.10.0
libtpu: 0.0.40
codegen_flags: <defaults>
</compile_context>

<pallas_src>
import jax
import jax.numpy as jnp
from jax.experimental import pallas as pl
from jax.experimental.pallas import tpu as pltpu


def _round_up(x, m):
    return ((x + m - 1) // m) * m


def _vmem_capacity_bytes():
    """Physical per-core VMEM; conservative 64 MiB (v7x) if the query fails."""
    try:
        cap = int(getattr(pltpu.get_tpu_info(), "vmem_capacity_bytes"))
        if cap > 0:
            return cap
    except Exception:
        pass
    return 64 * 1024 * 1024


def bert_image_embeddings_kernel(x_ref, wimg_ref, loc_ref, wloc_ref, ln_ref,
                                 o_ref):
    # Two MXU matmuls in the operands' native dtype; fp32 accumulation only.
    # The combined bias (b_img + b_loc) rides inside the loc matmul via a
    # ones column in loc and a bias row in W_loc^T.
    img = jnp.dot(x_ref[...], wimg_ref[...],
                  preferred_element_type=jnp.float32)
    loc = jnp.dot(loc_ref[...], wloc_ref[...],
                  preferred_element_type=jnp.float32)
    z = img + loc

    # TODO(synk): dropout is identity in eval mode; training-mode dropout
    # (pltpu.prng_random_bits mask) is intentionally not applied here.

    # LayerNorm over hidden dim, eps = 1e-12, two-pass stats (tile resident).
    inv_h = 1.0 / z.shape[-1]
    mean = jnp.sum(z, axis=-1, keepdims=True) * inv_h
    centered = z - mean
    var = jnp.sum(centered * centered, axis=-1, keepdims=True) * inv_h
    normed = centered * jax.lax.rsqrt(var + 1e-12)

    ln = ln_ref[...].astype(jnp.float32)      # (8, H): row0=gamma, row1=beta
    o_ref[...] = (normed * ln[0:1, :] + ln[1:2, :]).astype(o_ref.dtype)


def pack_params(w_img, b_img, w_loc, b_loc, gamma, beta, *, param_dtype=None):
    """One-time packing (hoisted out of the forward path).

    w_img: (H, F) PyTorch layout -> (F, H).
    w_loc: (H, 5) -> (LOCP, H) with an extra row carrying b_img + b_loc
           (paired with a ones column appended to the loc features).
    gamma/beta -> stacked into a single (8, H) operand.
    param_dtype: optionally cast matmul weights (e.g. jnp.bfloat16) for
           faster MXU passes / half the weight bytes; None keeps native dtype.
    """
    H, _ = w_img.shape
    Kl = w_loc.shape[1]
    LOCP = _round_up(Kl + 1, 8)               # +1 = ones column for fused bias

    w_img_t = jnp.asarray(w_img).T                                    # (F, H)
    w_loc_t = jnp.zeros((LOCP, H), dtype=w_loc.dtype)
    w_loc_t = w_loc_t.at[:Kl, :].set(jnp.asarray(w_loc).T)
    w_loc_t = w_loc_t.at[Kl, :].set(jnp.asarray(b_img) + jnp.asarray(b_loc))

    ln_params = jnp.zeros((8, H), dtype=gamma.dtype)
    ln_params = ln_params.at[0, :].set(gamma)
    ln_params = ln_params.at[1, :].set(beta)

    if param_dtype is not None:
        w_img_t = w_img_t.astype(param_dtype)
        w_loc_t = w_loc_t.astype(param_dtype)
    return (w_img_t, w_loc_t, ln_params)


def bert_image_embeddings(input_ids, input_loc, packed, *, tile_m=None):
    """input_ids: (B, S, F); input_loc: (B, S, 5); packed = pack_params(...).
    Returns (B, S, H)."""
    w_img_t, w_loc_t, ln_params = packed
    B, S, F = input_ids.shape
    Kl = input_loc.shape[-1]
    LOCP, H = w_loc_t.shape
    M = B * S

    # x: free reshape, NO padding copy. The ragged last block (if any) is
    # handled by the cdiv grid + Pallas block clipping.
    x2 = input_ids.reshape(M, F)
    # loc is tiny (K=5): pad K -> LOCP and append the ones column that
    # carries the fused bias. Negligible HBM traffic vs x.
    loc2 = jnp.zeros((M, LOCP), dtype=input_loc.dtype)
    loc2 = loc2.at[:, :Kl].set(input_loc.reshape(M, Kl))
    loc2 = loc2.at[:, Kl].set(1.0)

    # --- generation-aware tile sizing -------------------------------------
    cap = _vmem_capacity_bytes()
    budget = cap * 3 // 4                      # ~96 MiB v5e/v6e, ~48 MiB v7x

    act_isz = jnp.dtype(input_ids.dtype).itemsize
    loc_isz = jnp.dtype(input_loc.dtype).itemsize
    w_isz = jnp.dtype(w_img_t.dtype).itemsize
    ln_isz = jnp.dtype(ln_params.dtype).itemsize
    out_isz = act_isz

    if tile_m is None:
        tile_m = 1024 if cap >= 96 * 1024 * 1024 else 512
    tile_m = max(8, min(_round_up(tile_m, 8), _round_up(M, 8)))
    # Keep >= 2 grid steps (when possible) so v7x's second TC isn't idle;
    # costs at most one extra ~0.35 us grid step on single-TC chips.
    if M > 8:
        tile_m = min(tile_m, max(8, _round_up((M + 1) // 2, 8)))

    def footprint(tm):
        tiles = 2 * tm * (F * act_isz + LOCP * loc_isz + H * out_isz)  # dbl-buf I/O
        weights = (F * H + LOCP * H) * w_isz + 8 * H * ln_isz          # single-buf
        temps = 4 * tm * H * 4                                         # fp32 epilogue
        return tiles + weights + temps

    while tile_m > 8 and footprint(tile_m) > budget:
        tile_m = max(8, _round_up(tile_m // 2, 8))

    grid = (pl.cdiv(M, tile_m),)
    vmem_limit = int(min(cap - cap // 8,
                         max(32 * 1024 * 1024, footprint(tile_m) * 5 // 4)))

    # --- pallas_call -------------------------------------------------------
    def make_call(weight_mode):
        wkw = {} if weight_mode is None else {"pipeline_mode": weight_mode}
        return pl.pallas_call(
            bert_image_embeddings_kernel,
            out_shape=jax.ShapeDtypeStruct((M, H), input_ids.dtype),
            grid_spec=pltpu.PrefetchScalarGridSpec(
                num_scalar_prefetch=0,
                grid=grid,
                in_specs=[
                    pl.BlockSpec((tile_m, F), lambda i: (i, 0)),         # x
                    pl.BlockSpec((F, H), lambda i: (0, 0), **wkw),       # W_img^T
                    pl.BlockSpec((tile_m, LOCP), lambda i: (i, 0)),      # loc(+1s)
                    pl.BlockSpec((LOCP, H), lambda i: (0, 0), **wkw),    # W_loc^T(+bias)
                    pl.BlockSpec((8, H), lambda i: (0, 0), **wkw),       # gamma/beta
                ],
                out_specs=pl.BlockSpec((tile_m, H), lambda i: (i, 0)),
            ),
            compiler_params=pltpu.CompilerParams(
                dimension_semantics=("parallel",),
                vmem_limit_bytes=vmem_limit),
        )

    args = (x2, w_img_t, loc2, w_loc_t, ln_params)
    try:
        # Grid-invariant operands: single-buffered (frees VMEM for bigger tiles).
        out2 = make_call(pl.Buffered(1))(*args)
    except Exception:
        # TODO(synk): pl.Buffered(1) unsupported here; fall back to default
        # double-buffered weight specs (correct, slightly more VMEM).
        out2 = make_call(None)(*args)

    return out2.reshape(B, S, H)


def bert_image_embeddings_ref(input_ids, input_loc, w_img, b_img, w_loc,
                              b_loc, gamma, beta):
    img = jnp.einsum("bsf,hf->bsh", input_ids, w_img) + b_img
    loc = jnp.einsum("bsk,hk->bsh", input_loc, w_loc) + b_loc
    z = img + loc
    mean = jnp.mean(z, axis=-1, keepdims=True)
    var = jnp.mean((z - mean) ** 2, axis=-1, keepdims=True)
    return (z - mean) * jax.lax.rsqrt(var + 1e-12) * gamma + beta


if __name__ == "__main__":
    # Small ViLBERT-like config: v_feature_size=128, v_hidden_size=32,
    # batch=2, 8 image regions, 5-dim spatial location features.
    B, S, F, H = 2, 8, 128, 32

    key = jax.random.PRNGKey(0)
    k1, k2, k3, k4, k5, k6, k7 = jax.random.split(key, 7)

    input_ids = jax.random.normal(k1, (B, S, F), dtype=jnp.float32)
    input_loc = jax.random.uniform(k2, (B, S, 5), dtype=jnp.float32)

    # Deterministic parameter init (Linear weights in PyTorch (out, in) layout).
    w_img = jax.random.normal(k3, (H, F), dtype=jnp.float32) * 0.02
    b_img = jax.random.normal(k4, (H,), dtype=jnp.float32) * 0.02
    w_loc = jax.random.normal(k5, (H, 5), dtype=jnp.float32) * 0.02
    b_loc = jax.random.normal(k6, (H,), dtype=jnp.float32) * 0.02
    gamma = 1.0 + 0.01 * jax.random.normal(k7, (H,), dtype=jnp.float32)
    beta = jnp.zeros((H,), dtype=jnp.float32)

    # One-time weight packing (transpose + bias fusion), hoisted out of the
    # call path. (param_dtype=jnp.bfloat16 is available for production.)
    packed = pack_params(w_img, b_img, w_loc, b_loc, gamma, beta)

    out = bert_image_embeddings(input_ids, input_loc, packed)
    out = jax.block_until_ready(out)

    ref = bert_image_embeddings_ref(input_ids, input_loc, w_img, b_img,
                                    w_loc, b_loc, gamma, beta)
    assert out.shape == (B, S, H)
    assert jnp.allclose(out, ref, atol=1e-4, rtol=1e-4), "mismatch vs reference"

    print("KERNEL_OK")
</pallas_src>

<mosaic_0001>
module attributes {stable_mosaic.version = 11 : i64} {
  func.func @bert_image_embeddings_kernel(%arg0: i32, %arg1: memref<8x128xf32, #tpu.memory_space<vmem>>, %arg2: memref<128x32xf32, #tpu.memory_space<vmem>>, %arg3: memref<8x8xf32, #tpu.memory_space<vmem>>, %arg4: memref<8x32xf32, #tpu.memory_space<vmem>>, %arg5: memref<8x32xf32, #tpu.memory_space<vmem>>, %arg6: memref<8x32xf32, #tpu.memory_space<vmem>>) attributes {dimension_semantics = [#tpu.dimension_semantics<parallel>], iteration_bounds = array<i64: 2>, scalar_prefetch = 0 : i64, scratch_operands = 0 : i64, tpu.core_type = #tpu.core_type<tc>, window_params = [{transform_indices = @transform_0, window_bounds = array<i64: 8, 128>}, {pipeline_mode = #tpu.pipeline_mode<synchronous>, transform_indices = @transform_1, window_bounds = array<i64: 128, 32>}, {transform_indices = @transform_2, window_bounds = array<i64: 8, 8>}, {pipeline_mode = #tpu.pipeline_mode<synchronous>, transform_indices = @transform_3, window_bounds = array<i64: 8, 32>}, {pipeline_mode = #tpu.pipeline_mode<synchronous>, transform_indices = @transform_4, window_bounds = array<i64: 8, 32>}, {transform_indices = @transform_5, window_bounds = array<i64: 8, 32>}]} {
    %c0 = arith.constant 0 : index
    %c0_0 = arith.constant 0 : index
    %0 = vector.load %arg1[%c0, %c0_0] : memref<8x128xf32, #tpu.memory_space<vmem>>, vector<8x128xf32>
    %c0_1 = arith.constant 0 : index
    %c0_2 = arith.constant 0 : index
    %1 = vector.load %arg2[%c0_1, %c0_2] : memref<128x32xf32, #tpu.memory_space<vmem>>, vector<128x32xf32>
    %cst = arith.constant dense<0.000000e+00> : vector<8x32xf32>
    %2 = tpu.matmul %0, %1, %cst {dimension_numbers = #tpu.dot_dimension_numbers<[1], [0], [0], [1], [0, 0, 1, 1], [], []>} : vector<8x128xf32>, vector<128x32xf32>, vector<8x32xf32> -> vector<8x32xf32>
    %c0_3 = arith.constant 0 : index
    %c0_4 = arith.constant 0 : index
    %3 = vector.load %arg3[%c0_3, %c0_4] : memref<8x8xf32, #tpu.memory_space<vmem>>, vector<8x8xf32>
    %c0_5 = arith.constant 0 : index
    %c0_6 = arith.constant 0 : index
    %4 = vector.load %arg4[%c0_5, %c0_6] : memref<8x32xf32, #tpu.memory_space<vmem>>, vector<8x32xf32>
    %cst_7 = arith.constant dense<0.000000e+00> : vector<8x32xf32>
    %5 = tpu.matmul %3, %4, %cst_7 {dimension_numbers = #tpu.dot_dimension_numbers<[1], [0], [0], [1], [0, 0, 1, 1], [], []>} : vector<8x8xf32>, vector<8x32xf32>, vector<8x32xf32> -> vector<8x32xf32>
    %6 = arith.addf %2, %5 : vector<8x32xf32>
    %cst_8 = arith.constant dense<0.000000e+00> : vector<8xf32>
    %7 = vector.multi_reduction <add>, %6, %cst_8 [1] : vector<8x32xf32> to vector<8xf32>
    %8 = vector.shape_cast %7 : vector<8xf32> to vector<8x1xf32>
    %cst_9 = arith.constant 3.125000e-02 : f32
    %9 = vector.broadcast %cst_9 : f32 to vector<8x1xf32>
    %10 = arith.mulf %8, %9 : vector<8x1xf32>
    %11 = vector.broadcast %10 : vector<8x1xf32> to vector<8x32xf32>
    %12 = arith.subf %6, %11 : vector<8x32xf32>
    %13 = arith.mulf %12, %12 : vector<8x32xf32>
    %cst_10 = arith.constant dense<0.000000e+00> : vector<8xf32>
    %14 = vector.multi_reduction <add>, %13, %cst_10 [1] : vector<8x32xf32> to vector<8xf32>
    %15 = vector.shape_cast %14 : vector<8xf32> to vector<8x1xf32>
    %cst_11 = arith.constant 3.125000e-02 : f32
    %16 = vector.broadcast %cst_11 : f32 to vector<8x1xf32>
    %17 = arith.mulf %15, %16 : vector<8x1xf32>
    %cst_12 = arith.constant 9.99999996E-13 : f32
    %18 = vector.broadcast %cst_12 : f32 to vector<8x1xf32>
    %19 = arith.addf %17, %18 : vector<8x1xf32>
    %20 = math.rsqrt %19 : vector<8x1xf32>
    %21 = vector.broadcast %20 : vector<8x1xf32> to vector<8x32xf32>
    %22 = arith.mulf %12, %21 : vector<8x32xf32>
    %c0_13 = arith.constant 0 : index
    %c0_14 = arith.constant 0 : index
    %23 = vector.load %arg5[%c0_13, %c0_14] : memref<8x32xf32, #tpu.memory_space<vmem>>, vector<8x32xf32>
    %24 = vector.extract_strided_slice %23 {offsets = [0, 0], sizes = [1, 32], strides = [1, 1]} : vector<8x32xf32> to vector<1x32xf32>
    %25 = vector.broadcast %24 : vector<1x32xf32> to vector<8x32xf32>
    %26 = arith.mulf %22, %25 : vector<8x32xf32>
    %27 = vector.extract_strided_slice %23 {offsets = [1, 0], sizes = [1, 32], strides = [1, 1]} : vector<8x32xf32> to vector<1x32xf32>
    %28 = vector.broadcast %27 : vector<1x32xf32> to vector<8x32xf32>
    %29 = arith.addf %26, %28 : vector<8x32xf32>
    %c0_15 = arith.constant 0 : index
    %c0_16 = arith.constant 0 : index
    %30 = vector.load %arg6[%c0_15, %c0_16] : memref<8x32xf32, #tpu.memory_space<vmem>>, vector<8x32xf32>
    tpu.vector_store %arg6[%c0_15, %c0_16], %29 {strides = array<i32>} : memref<8x32xf32, #tpu.memory_space<vmem>>, vector<8x32xf32>,
    return
  }
  func.func @transform_0(%arg0: i32) -> (i32, i32) {
    %c0_i32 = arith.constant 0 : i32
    %c0_i32_0 = arith.constant 0 : i32
    return %arg0, %c0_i32 : i32, i32
  }
  func.func @transform_1(%arg0: i32) -> (i32, i32) {
    %c0_i32 = arith.constant 0 : i32
    %c0_i32_0 = arith.constant 0 : i32
    %c0_i32_1 = arith.constant 0 : i32
    return %c0_i32, %c0_i32_0 : i32, i32
  }
  func.func @transform_2(%arg0: i32) -> (i32, i32) {
    %c0_i32 = arith.constant 0 : i32
    %c0_i32_0 = arith.constant 0 : i32
    return %arg0, %c0_i32 : i32, i32
  }
  func.func @transform_3(%arg0: i32) -> (i32, i32) {
    %c0_i32 = arith.constant 0 : i32
    %c0_i32_0 = arith.constant 0 : i32
    %c0_i32_1 = arith.constant 0 : i32
    return %c0_i32, %c0_i32_0 : i32, i32
  }
  func.func @transform_4(%arg0: i32) -> (i32, i32) {
    %c0_i32 = arith.constant 0 : i32
    %c0_i32_0 = arith.constant 0 : i32
    %c0_i32_1 = arith.constant 0 : i32
    return %c0_i32, %c0_i32_0 : i32, i32
  }
  func.func @transform_5(%arg0: i32) -> (i32, i32) {
    %c0_i32 = arith.constant 0 : i32
    %c0_i32_0 = arith.constant 0 : i32
    return %arg0, %c0_i32 : i32, i32
  }
}

module attributes {stable_mosaic.version = 11 : i64} {
  func.func @bert_image_embeddings_kernel(%arg0: i32, %arg1: memref<8x128xf32, #tpu.memory_space<vmem>>, %arg2: memref<128x32xf32, #tpu.memory_space<vmem>>, %arg3: memref<8x8xf32, #tpu.memory_space<vmem>>, %arg4: memref<8x32xf32, #tpu.memory_space<vmem>>, %arg5: memref<8x32xf32, #tpu.memory_space<vmem>>, %arg6: memref<8x32xf32, #tpu.memory_space<vmem>>) attributes {dimension_semantics = [#tpu.dimension_semantics<parallel>], iteration_bounds = array<i64: 2>, scalar_prefetch = 0 : i64, scratch_operands = 0 : i64, tpu.core_type = #tpu.core_type<tc>, window_params = [{transform_indices = @transform_0, window_bounds = array<i64: 8, 128>}, {pipeline_mode = #tpu.pipeline_mode<synchronous>, transform_indices = @transform_1, window_bounds = array<i64: 128, 32>}, {transform_indices = @transform_2, window_bounds = array<i64: 8, 8>}, {pipeline_mode = #tpu.pipeline_mode<synchronous>, transform_indices = @transform_3, window_bounds = array<i64: 8, 32>}, {pipeline_mode = #tpu.pipeline_mode<synchronous>, transform_indices = @transform_4, window_bounds = array<i64: 8, 32>}, {transform_indices = @transform_5, window_bounds = array<i64: 8, 32>}]} {
    %c0 = arith.constant 0 : index
    %c0_0 = arith.constant 0 : index
    %0 = vector.load %arg1[%c0, %c0_0] : memref<8x128xf32, #tpu.memory_space<vmem>>, vector<8x128xf32>
    %c0_1 = arith.constant 0 : index
    %c0_2 = arith.constant 0 : index
    %1 = vector.load %arg2[%c0_1, %c0_2] : memref<128x32xf32, #tpu.memory_space<vmem>>, vector<128x32xf32>
    %cst = arith.constant dense<0.000000e+00> : vector<8x32xf32>
    %2 = tpu.matmul %0, %1, %cst {dimension_numbers = #tpu.dot_dimension_numbers<[1], [0], [0], [1], [0, 0, 1, 1], [], []>} : vector<8x128xf32>, vector<128x32xf32>, vector<8x32xf32> -> vector<8x32xf32>
    %c0_3 = arith.constant 0 : index
    %c0_4 = arith.constant 0 : index
    %3 = vector.load %arg3[%c0_3, %c0_4] : memref<8x8xf32, #tpu.memory_space<vmem>>, vector<8x8xf32>
    %c0_5 = arith.constant 0 : index
    %c0_6 = arith.constant 0 : index
    %4 = vector.load %arg4[%c0_5, %c0_6] : memref<8x32xf32, #tpu.memory_space<vmem>>, vector<8x32xf32>
    %cst_7 = arith.constant dense<0.000000e+00> : vector<8x32xf32>
    %5 = tpu.matmul %3, %4, %cst_7 {dimension_numbers = #tpu.dot_dimension_numbers<[1], [0], [0], [1], [0, 0, 1, 1], [], []>} : vector<8x8xf32>, vector<8x32xf32>, vector<8x32xf32> -> vector<8x32xf32>
    %6 = arith.addf %2, %5 : vector<8x32xf32>
    %cst_8 = arith.constant dense<0.000000e+00> : vector<8xf32>
    %7 = vector.multi_reduction <add>, %6, %cst_8 [1] : vector<8x32xf32> to vector<8xf32>
    %8 = vector.shape_cast %7 : vector<8xf32> to vector<8x1xf32>
    %cst_9 = arith.constant 3.125000e-02 : f32
    %9 = vector.broadcast %cst_9 : f32 to vector<8x1xf32>
    %10 = arith.mulf %8, %9 : vector<8x1xf32>
    %11 = vector.broadcast %10 : vector<8x1xf32> to vector<8x32xf32>
    %12 = arith.subf %6, %11 : vector<8x32xf32>
    %13 = arith.mulf %12, %12 : vector<8x32xf32>
    %cst_10 = arith.constant dense<0.000000e+00> : vector<8xf32>
    %14 = vector.multi_reduction <add>, %13, %cst_10 [1] : vector<8x32xf32> to vector<8xf32>
    %15 = vector.shape_cast %14 : vector<8xf32> to vector<8x1xf32>
    %cst_11 = arith.constant 3.125000e-02 : f32
    %16 = vector.broadcast %cst_11 : f32 to vector<8x1xf32>
    %17 = arith.mulf %15, %16 : vector<8x1xf32>
    %cst_12 = arith.constant 9.99999996E-13 : f32
    %18 = vector.broadcast %cst_12 : f32 to vector<8x1xf32>
    %19 = arith.addf %17, %18 : vector<8x1xf32>
    %20 = math.rsqrt %19 : vector<8x1xf32>
    %21 = vector.broadcast %20 : vector<8x1xf32> to vector<8x32xf32>
    %22 = arith.mulf %12, %21 : vector<8x32xf32>
    %c0_13 = arith.constant 0 : index
    %c0_14 = arith.constant 0 : index
    %23 = vector.load %arg5[%c0_13, %c0_14] : memref<8x32xf32, #tpu.memory_space<vmem>>, vector<8x32xf32>
    %24 = vector.extract_strided_slice %23 {offsets = [0, 0], sizes = [1, 32], strides = [1, 1]} : vector<8x32xf32> to vector<1x32xf32>
    %25 = vector.broadcast %24 : vector<1x32xf32> to vector<8x32xf32>
    %26 = arith.mulf %22, %25 : vector<8x32xf32>
    %27 = vector.extract_strided_slice %23 {offsets = [1, 0], sizes = [1, 32], strides = [1, 1]} : vector<8x32xf32> to vector<1x32xf32>
    %28 = vector.broadcast %27 : vector<1x32xf32> to vector<8x32xf32>
    %29 = arith.addf %26, %28 : vector<8x32xf32>
    %c0_15 = arith.constant 0 : index
    %c0_16 = arith.constant 0 : index
    %30 = vector.load %arg6[%c0_15, %c0_16] : memref<8x32xf32, #tpu.memory_space<vmem>>, vector<8x32xf32>
    tpu.vector_store %arg6[%c0_15, %c0_16], %29 {strides = array<i32>} : memref<8x32xf32, #tpu.memory_space<vmem>>, vector<8x32xf32>,
    return
  }
  func.func @transform_0(%arg0: i32) -> (i32, i32) {
    %c0_i32 = arith.constant 0 : i32
    %c0_i32_0 = arith.constant 0 : i32
    return %arg0, %c0_i32 : i32, i32
  }
  func.func @transform_1(%arg0: i32) -> (i32, i32) {
    %c0_i32 = arith.constant 0 : i32
    %c0_i32_0 = arith.constant 0 : i32
    %c0_i32_1 = arith.constant 0 : i32
    return %c0_i32, %c0_i32_0 : i32, i32
  }
  func.func @transform_2(%arg0: i32) -> (i32, i32) {
    %c0_i32 = arith.constant 0 : i32
    %c0_i32_0 = arith.constant 0 : i32
    return %arg0, %c0_i32 : i32, i32
  }
  func.func @transform_3(%arg0: i32) -> (i32, i32) {
    %c0_i32 = arith.constant 0 : i32
    %c0_i32_0 = arith.constant 0 : i32
    %c0_i32_1 = arith.constant 0 : i32
    return %c0_i32, %c0_i32_0 : i32, i32
  }
  func.func @transform_4(%arg0: i32) -> (i32, i32) {
    %c0_i32 = arith.constant 0 : i32
    %c0_i32_0 = arith.constant 0 : i32
    %c0_i32_1 = arith.constant 0 : i32
    return %c0_i32, %c0_i32_0 : i32, i32
  }
  func.func @transform_5(%arg0: i32) -> (i32, i32) {
    %c0_i32 = arith.constant 0 : i32
    %c0_i32_0 = arith.constant 0 : i32
    return %arg0, %c0_i32 : i32, i32
  }
}

</mosaic_0001>

<bundles_post_ra>
// kernel: tpu_custom_call.1
= control target key start
LH: loop header
LB: loop body
LE: loop exit
PB: predicated region body
PF: predicated region fallthrough
CT: control target
= control target key end

     0   :  { %10 = vsyncpa [#allocation3], 0  ;;  %s715_s0 = inlined_call_operand.vmem [shape: f32[16,128], index: 0, kind: input, shape index: {}]   ;;  %s716_s1 = inlined_call_operand.vmem [shape: f32[128,32], index: 1, kind: input, shape index: {}]   ;;  %s717_s2 = inlined_call_operand.vmem [shape: f32[16,8], index: 2, kind: input, shape index: {}]   ;;  %s718_s3 = inlined_call_operand.vmem [shape: f32[8,32], index: 3, kind: input, shape index: {}]   ;;  %s719_s4 = inlined_call_operand.vmem [shape: f32[8,32], index: 4, kind: input, shape index: {}]   ;;  %s720_s5 = inlined_call_operand.hbm [shape: f32[16,32], index: 5, kind: output, shape index: {}]  }
   0x1   :  { %12 = vsyncpa [#allocation3 + $0x1], 0  ;;  %s563_s18 = smov 0   ;;  %s565_s19 = smov 0  }
   0x2   :  { %s567_s20 = smov 0   ;;  %s569_s21 = smov 0  }
   0x3 LB: > { %s584_s22 = sadd.s32 4294967295, %s531_s21   ;;  %s416_s23 = sadd.s32 4294967294, %s531_s21   ;;  %s531_s21 = sphi %s569_s21, %s726_s21   ;;  %s527_s20 = sphi %s567_s20, %s725_s20   ;;  %s523_s19 = sphi %s565_s19, %s724_s19   ;;  %s519_s18 = sphi %s563_s18, %s723_s18  }
   0x4   : > { %s588_s24 = sadd.s32 1, %s531_s21   ;;  %s140_s25 = sadd.s32 1, %s527_s20 }
   0x5   : > { %s137_s26 = ssub.s32 %s531_s21, %s588_s24  ;;  %p150_p0 = scmp.ne.s32.totalorder %s527_s20, %s523_s19 }
   0x6   : > { %p138_p1 = scmp.eq.s32.totalorder %s137_s26, 0  ;;  %p151_p2 = scmp.eq.s32.totalorder %s584_s22, 1 }
   0x7   : > { %p156_p3 = scmp.ne.s32.totalorder %s523_s19, %s519_s18  ;;  %p157_p4 = scmp.eq.s32.totalorder %s416_s23, 1 }
   0x8   : > { %s599_s27 = scalar_select %p138_p1, %s527_s20, %s140_s25  }
   0x9   : > { %p601_p5 = por %p151_p2, %p150_p0  ;;  %p605_p6 = por %p157_p4, %p156_p3 }
   0xa   : > { %p419_p7 = scmp.ge.s32.totalorder %s531_s21, 1  ;;  %p198_p8 = scmp.lt.s32.totalorder %s531_s21, 3 }
   0xc   : > { %p199_p9 = pnand %p419_p7, %p198_p8 }
   0xd   : > { %p229_p10 = scmp.lt.s32.totalorder (!%p199_p9), %s584_s22, 1  ;;  %s425_s30 = sshll.u32 (!%p199_p9), %s584_s22, 3 }
   0xe   : > { %202 = sbr.rel (%p199_p9) target bundleno = 450 (0x1c2), region = 40  ;;  %s340_s8 = scalar_lea.hbm (!%p199_p9), %s720_s5, %s425_s30 }
   0xf   : > { %s344_s12 = sshll.u32 (!%p199_p9), %s340_s8, 4  ;;  %s489_s23 = scalar_lea.hbm (!%p199_p9), %s720_s5, 16  ;;  %s345_s12 = int_to_ptr.hbm [resolvable:$true] %s344_s12 }
  0x10   : > { %s483_s13 = sshra.s32 (!%p199_p9), %s345_s12, 4  ;;  %s484_s13 = int_to_ptr.hbm [resolvable:$true] %s483_s13 }
  0x11   : > { %s485_s15 = scalar_lea.hbm (!%p199_p9), %s484_s13, 8  ;;  %p490_p0 = scmp.lt.s32.totalorder (!%p199_p9), %s484_s13, %s720_s5 }
  0x12   : > { %p486_p11 = scmp.ne.s32.totalorder (!%p199_p9), %s484_s13, %s485_s15  ;;  %p491_p1 = scmp.lt.s32.totalorder (!%p199_p9), %s489_s23, %s485_s15 }
  0x13   : > { %v253_v0 = vld [vmem:[%s716_s1 + $0x78] sm:$0xff]  ;;  %v252_v1 = vld [vmem:[%s716_s1 + $0x70] sm:$0xff]  ;;  %v251_v2 = vld [vmem:[%s716_s1 + $0x68] sm:$0xff]  ;;  %s622_s11 = scalar_select %p229_p10, %s584_s22, 1  ;;  %vm256_vm0 = vcmask 64512   ;;  %vm300_vm1 = vcmask 261120  }
  0x14   : > { %280 = vmatpush.msra.mxu1 %v253_v0  ;;  %v250_v3 = vld [vmem:[%s716_s1 + $0x60] sm:$0xff]  ;;  %v249_v5 = vld [vmem:[%s716_s1 + $0x58] sm:$0xff]  ;;  %v248_v7 = vld [vmem:[%s716_s1 + $0x50] sm:$0xff]  ;;  %p487_p12 = pnand %p486_p11, %p601_p5  ;;  %p492_p2 = por %p491_p1, %p490_p0 }
  0x15   : > { %s421_s14 = sshll.u32 %s622_s11, 3  ;;  %v255_v4 = vld [vmem:[%s718_s3] sm:$0xff]  ;;  %v247_v8 = vld [vmem:[%s716_s1 + $0x48] sm:$0xff]  ;;  %v245_v10 = vld [vmem:[%s716_s1 + $0x38] sm:$0xff]  ;;  %s226_s11 = sand.u32 1, %s523_s19  }
  0x16   : > { %281 = vmatpush.msra.mxu1 %v252_v1  ;;  %s236_s25 = scalar_lea.vmem %s717_s2, %s421_s14  ;;  %275 = vmatpush.msra.mxu0 %v255_v4  ;;  %v246_v9 = vld [vmem:[%s716_s1 + $0x40] sm:$0xff]  ;;  %v244_v11 = vld [vmem:[%s716_s1 + $0x30] sm:$0xff]  ;;  %v243_v12 = vld [vmem:[%s716_s1 + $0x28] sm:$0xff]  ;;  %s232_s16 = scalar_lea.vmem %s715_s0, %s421_s14 }
  0x17   : > { %v254_v6 = vld [vmem:[%s236_s25] sm:$0xff]  ;;  %v241_v14 = vld [vmem:[%s716_s1 + $0x18] sm:$0xff]  ;;  %v240_v15 = vld [vmem:[%s716_s1 + $0x10] sm:$0xff]  ;;  %s420_s14 = sshll.u32 %s226_s11, 3  ;;  %s330_s22 = scalar_lea.sflag [#allocation3], %s226_s11 }
  0x18   : > { %282 = vmatpush.msra.mxu1 %v251_v2  ;;  %423 = vmatmul.msk.f32.vlgmr.msra.gmra.mxu0 %vm256_vm0, %v254_v6  ;;  %v242_v13 = vld [vmem:[%s716_s1 + $0x20] sm:$0xff]  ;;  %v239_v16 = vld [vmem:[%s716_s1 + $0x8] sm:$0xff]  ;;  %s228_s9 = scalar_lea.vmem [#allocation2], %s420_s14  ;;  %p488_p13 = pneg %p487_p12 }
  0x19   : > { %v238_v17 = vld [vmem:[%s716_s1] sm:$0xff]  ;;  %s342_s10 = sshll.u32 %s228_s9, 4  ;;  %s343_s10 = int_to_ptr.vmem [resolvable:$true] %s342_s10 }
  0x1a   : > { %283 = vmatpush.msra.mxu1 %v250_v3  ;;  %v237_v18 = vld [vmem:[%s232_s16] sm:$0xff]  ;;  %p493_p3 = pnand %p492_p2, %p488_p13 }
  0x1b   : > { %v323_v36 = vld [vmem:[%s719_s4] sm:$0xff] }
  0x1c   : > { %284 = vmatpush.msra.mxu1 %v249_v5  ;;  %v324_v38 = vperm.slane %v323_v36, 0  ;;  %v326_v41 = vperm.slane %v323_v36, 1 }
  0x1e   : > { %285 = vmatpush.msra.mxu1 %v248_v7 }
  0x20   : > { %286 = vmatpush.msra.mxu1 %v247_v8 }
  0x22   : > { %287 = vmatpush.msra.mxu1 %v246_v9 }
  0x24   : > { %288 = vmatpush.msra.mxu1 %v245_v10 }
  0x26   : > { %289 = vmatpush.msra.mxu1 %v244_v11 }
  0x28   : > { %290 = vmatpush.msra.mxu1 %v243_v12 }
  0x2a   : > { %291 = vmatpush.msra.mxu1 %v242_v13 }
  0x2c   : > { %292 = vmatpush.msra.mxu1 %v241_v14 }
  0x2e   : > { %293 = vmatpush.msra.mxu1 %v240_v15 }
  0x30   : > { %294 = vmatpush.msra.mxu1 %v239_v16 }
  0x32   : > { %295 = vmatpush.msra.mxu1 %v238_v17 }
  0x33   : > { %296 = vmatmul.f32.vlgmr.msra.gmra.mxu1 %v237_v18 }
  0x95   : > { %v277_v19 = vpop.f32.mrf.mxu0 }
  0xb0   : > { %v297_v20 = vpop.f32.mrf.mxu1 }
  0xb1   : > { %v298_v21 = vadd.f32 %v297_v20, %v277_v19 }
  0xb3   : > { %v301_v22 = vsel %vm300_vm1, %v298_v21, 0.0 }
  0xb4   : > { %302 = vadd.xlane.f32.xlu0 %v301_v22 }
 0x127   : > { %v303_v23 = vpop.xlane.xlu0 %302 }
 0x128   : > { %v304_v24 = vmul.f32 0.03125, %v303_v23 }
 0x12a   : > { %v305_v25 = vsub.f32 %v298_v21, %v304_v24 }
 0x12c   : > { %v306_v26 = vmul.f32 %v305_v25, %v305_v25 }
 0x12e   : > { %v307_v27 = vsel %vm300_vm1, %v306_v26, 0.0 }
 0x12f   : > { %308 = vadd.xlane.f32.xlu0 %v307_v27 }
 0x1a2   : > { %v309_v28 = vpop.xlane.xlu0 %308 }
 0x1a3   : > { %v310_v29 = vmul.f32 0.03125, %v309_v28 }
 0x1a5   : > { %v311_v30 = vadd.f32 1e-12, %v310_v29 }
 0x1a7   : > { %467 = vrsqrt.f32 %v311_v30  ;;  %vm318_vm3 = vweird.f32 %v311_v30 }
 0x1ad   : > { %v468_v31 = vpop.eup %467 }
 0x1ae   : > { %v313_v32 = vmul.f32 %v468_v31, %v311_v30  ;;  %vm319_vm2 = vweird.f32 %v468_v31 }
 0x1af   : > { %vm320_vm4 = vmor %vm318_vm3, %vm319_vm2 }
 0x1b0   : > { %v314_v33 = vmul.f32 %v468_v31, %v313_v32 }
 0x1b2   : > { %v315_v34 = vmul.f32 0.5, %v314_v33 }
 0x1b4   : > { %v316_v35 = vsub.f32 1.5, %v315_v34 }
 0x1b6   : > { %v317_v37 = vmul.f32 %v468_v31, %v316_v35 }
 0x1b8   : > { %v321_v39 = vsel %vm320_vm4, %v468_v31, %v317_v37 }
 0x1b9   : > { %v322_v40 = vmul.f32 %v321_v39, %v305_v25 }
 0x1bb   : > { %v325_v42 = vmul.f32 %v324_v38, %v322_v40 }
 0x1bd   : > { %v327_v43 = vadd.f32 %v326_v41, %v325_v42 }
 0x1bf   : > { %328 = vst.msk [vmem:[%s228_s9] sm:$0xff] %vm300_vm1, %v327_v43 }
 0x1c0   : > { %496 = shalt.err (!%p493_p3)
}
 0x1c1   : > { %428 = dma.vmem_to_hbm [thread:$0]  (%p601_p5), %s343_s10, 128, %s345_s12, %s330_s22  }
 0x1c2 PF: > { %p434_p4 = scmp.ge.s32.totalorder %s531_s21, 2  ;;  %s356_s11 = sand.u32 1, %s519_s18  }
 0x1c3   : > { %s357_s26 = scalar_lea.sflag [#allocation3], %s356_s11 }
 0x1c4   : > { %p431_p7 = pnand %p434_p4, %p605_p6 }
 0x1c6   : > { %p432_p8 = pneg %p431_p7 }
 0x1c8   : > { %514 = dma.done.wait (%p432_p8), %s357_s26, 128  }
 0x1c9   : > { %516 = vsyncadd (%p432_p8), %s357_s26, 4294967168  ;;  %p15_p9 = scmp.ge.s32.totalorder %s588_s24, 4   ;;  %s723_s18 = smov %s523_s19 }
 0x1ca   : > { %s724_s19 = smov %s527_s20  ;;  %s725_s20 = smov %s599_s27 }
 0x1cb   : > { %s726_s21 = smov %s588_s24  ;;  %17 = sbr.rel (!%p15_p9) target bundleno = 3 (0x3), region = 78 }
 0x1d0   :  { %363 = vsyncpa [#allocation3], 1 }
 0x1d1   :  { %365 = vsyncpa [#allocation3 + $0x1], 1 }

// kernel: tpu_custom_call.1
= control target key start
LH: loop header
LB: loop body
LE: loop exit
PB: predicated region body
PF: predicated region fallthrough
CT: control target
= control target key end

     0   :  { %10 = vsyncpa [#allocation3], 0  ;;  %s715_s0 = inlined_call_operand.vmem [shape: f32[16,128], index: 0, kind: input, shape index: {}]   ;;  %s716_s1 = inlined_call_operand.vmem [shape: f32[128,32], index: 1, kind: input, shape index: {}]   ;;  %s717_s2 = inlined_call_operand.vmem [shape: f32[16,8], index: 2, kind: input, shape index: {}]   ;;  %s718_s3 = inlined_call_operand.vmem [shape: f32[8,32], index: 3, kind: input, shape index: {}]   ;;  %s719_s4 = inlined_call_operand.vmem [shape: f32[8,32], index: 4, kind: input, shape index: {}]   ;;  %s720_s5 = inlined_call_operand.hbm [shape: f32[16,32], index: 5, kind: output, shape index: {}]  }
   0x1   :  { %12 = vsyncpa [#allocation3 + $0x1], 0  ;;  %s563_s18 = smov 0   ;;  %s565_s19 = smov 0  }
   0x2   :  { %s567_s20 = smov 0   ;;  %s569_s21 = smov 0  }
   0x3 LB: > { %s584_s22 = sadd.s32 4294967295, %s531_s21   ;;  %s416_s23 = sadd.s32 4294967294, %s531_s21   ;;  %s531_s21 = sphi %s569_s21, %s726_s21   ;;  %s527_s20 = sphi %s567_s20, %s725_s20   ;;  %s523_s19 = sphi %s565_s19, %s724_s19   ;;  %s519_s18 = sphi %s563_s18, %s723_s18  }
   0x4   : > { %s588_s24 = sadd.s32 1, %s531_s21   ;;  %s140_s25 = sadd.s32 1, %s527_s20 }
   0x5   : > { %s137_s26 = ssub.s32 %s531_s21, %s588_s24  ;;  %p150_p0 = scmp.ne.s32.totalorder %s527_s20, %s523_s19 }
   0x6   : > { %p138_p1 = scmp.eq.s32.totalorder %s137_s26, 0  ;;  %p151_p2 = scmp.eq.s32.totalorder %s584_s22, 1 }
   0x7   : > { %p156_p3 = scmp.ne.s32.totalorder %s523_s19, %s519_s18  ;;  %p157_p4 = scmp.eq.s32.totalorder %s416_s23, 1 }
   0x8   : > { %s599_s27 = scalar_select %p138_p1, %s527_s20, %s140_s25  }
   0x9   : > { %p601_p5 = por %p151_p2, %p150_p0  ;;  %p605_p6 = por %p157_p4, %p156_p3 }
   0xa   : > { %p419_p7 = scmp.ge.s32.totalorder %s531_s21, 1  ;;  %p198_p8 = scmp.lt.s32.totalorder %s531_s21, 3 }
   0xc   : > { %p199_p9 = pnand %p419_p7, %p198_p8 }
   0xd   : > { %p229_p10 = scmp.lt.s32.totalorder (!%p199_p9), %s584_s22, 1  ;;  %s425_s30 = sshll.u32 (!%p199_p9), %s584_s22, 3 }
   0xe   : > { %202 = sbr.rel (%p199_p9) target bundleno = 450 (0x1c2), region = 40  ;;  %s340_s8 = scalar_lea.hbm (!%p199_p9), %s720_s5, %s425_s30 }
   0xf   : > { %s344_s12 = sshll.u32 (!%p199_p9), %s340_s8, 4  ;;  %s489_s23 = scalar_lea.hbm (!%p199_p9), %s720_s5, 16  ;;  %s345_s12 = int_to_ptr.hbm [resolvable:$true] %s344_s12 }
  0x10   : > { %s483_s13 = sshra.s32 (!%p199_p9), %s345_s12, 4  ;;  %s484_s13 = int_to_ptr.hbm [resolvable:$true] %s483_s13 }
  0x11   : > { %s485_s15 = scalar_lea.hbm (!%p199_p9), %s484_s13, 8  ;;  %p490_p0 = scmp.lt.s32.totalorder (!%p199_p9), %s484_s13, %s720_s5 }
  0x12   : > { %p486_p11 = scmp.ne.s32.totalorder (!%p199_p9), %s484_s13, %s485_s15  ;;  %p491_p1 = scmp.lt.s32.totalorder (!%p199_p9), %s489_s23, %s485_s15 }
  0x13   : > { %v253_v0 = vld [vmem:[%s716_s1 + $0x78] sm:$0xff]  ;;  %v252_v1 = vld [vmem:[%s716_s1 + $0x70] sm:$0xff]  ;;  %v251_v2 = vld [vmem:[%s716_s1 + $0x68] sm:$0xff]  ;;  %s622_s11 = scalar_select %p229_p10, %s584_s22, 1  ;;  %vm256_vm0 = vcmask 64512   ;;  %vm300_vm1 = vcmask 261120  }
  0x14   : > { %280 = vmatpush.msra.mxu1 %v253_v0  ;;  %v250_v3 = vld [vmem:[%s716_s1 + $0x60] sm:$0xff]  ;;  %v249_v5 = vld [vmem:[%s716_s1 + $0x58] sm:$0xff]  ;;  %v248_v7 = vld [vmem:[%s716_s1 + $0x50] sm:$0xff]  ;;  %p487_p12 = pnand %p486_p11, %p601_p5  ;;  %p492_p2 = por %p491_p1, %p490_p0 }
  0x15   : > { %s421_s14 = sshll.u32 %s622_s11, 3  ;;  %v255_v4 = vld [vmem:[%s718_s3] sm:$0xff]  ;;  %v247_v8 = vld [vmem:[%s716_s1 + $0x48] sm:$0xff]  ;;  %v245_v10 = vld [vmem:[%s716_s1 + $0x38] sm:$0xff]  ;;  %s226_s11 = sand.u32 1, %s523_s19  }
  0x16   : > { %281 = vmatpush.msra.mxu1 %v252_v1  ;;  %s236_s25 = scalar_lea.vmem %s717_s2, %s421_s14  ;;  %275 = vmatpush.msra.mxu0 %v255_v4  ;;  %v246_v9 = vld [vmem:[%s716_s1 + $0x40] sm:$0xff]  ;;  %v244_v11 = vld [vmem:[%s716_s1 + $0x30] sm:$0xff]  ;;  %v243_v12 = vld [vmem:[%s716_s1 + $0x28] sm:$0xff]  ;;  %s232_s16 = scalar_lea.vmem %s715_s0, %s421_s14 }
  0x17   : > { %v254_v6 = vld [vmem:[%s236_s25] sm:$0xff]  ;;  %v241_v14 = vld [vmem:[%s716_s1 + $0x18] sm:$0xff]  ;;  %v240_v15 = vld [vmem:[%s716_s1 + $0x10] sm:$0xff]  ;;  %s420_s14 = sshll.u32 %s226_s11, 3  ;;  %s330_s22 = scalar_lea.sflag [#allocation3], %s226_s11 }
  0x18   : > { %282 = vmatpush.msra.mxu1 %v251_v2  ;;  %423 = vmatmul.msk.f32.vlgmr.msra.gmra.mxu0 %vm256_vm0, %v254_v6  ;;  %v242_v13 = vld [vmem:[%s716_s1 + $0x20] sm:$0xff]  ;;  %v239_v16 = vld [vmem:[%s716_s1 + $0x8] sm:$0xff]  ;;  %s228_s9 = scalar_lea.vmem [#allocation2], %s420_s14  ;;  %p488_p13 = pneg %p487_p12 }
  0x19   : > { %v238_v17 = vld [vmem:[%s716_s1] sm:$0xff]  ;;  %s342_s10 = sshll.u32 %s228_s9, 4  ;;  %s343_s10 = int_to_ptr.vmem [resolvable:$true] %s342_s10 }
  0x1a   : > { %283 = vmatpush.msra.mxu1 %v250_v3  ;;  %v237_v18 = vld [vmem:[%s232_s16] sm:$0xff]  ;;  %p493_p3 = pnand %p492_p2, %p488_p13 }
  0x1b   : > { %v323_v36 = vld [vmem:[%s719_s4] sm:$0xff] }
  0x1c   : > { %284 = vmatpush.msra.mxu1 %v249_v5  ;;  %v324_v38 = vperm.slane %v323_v36, 0  ;;  %v326_v41 = vperm.slane %v323_v36, 1 }
  0x1e   : > { %285 = vmatpush.msra.mxu1 %v248_v7 }
  0x20   : > { %286 = vmatpush.msra.mxu1 %v247_v8 }
  0x22   : > { %287 = vmatpush.msra.mxu1 %v246_v9 }
  0x24   : > { %288 = vmatpush.msra.mxu1 %v245_v10 }
  0x26   : > { %289 = vmatpush.msra.mxu1 %v244_v11 }
  0x28   : > { %290 = vmatpush.msra.mxu1 %v243_v12 }
  0x2a   : > { %291 = vmatpush.msra.mxu1 %v242_v13 }
  0x2c   : > { %292 = vmatpush.msra.mxu1 %v241_v14 }
  0x2e   : > { %293 = vmatpush.msra.mxu1 %v240_v15 }
  0x30   : > { %294 = vmatpush.msra.mxu1 %v239_v16 }
  0x32   : > { %295 = vmatpush.msra.mxu1 %v238_v17 }
  0x33   : > { %296 = vmatmul.f32.vlgmr.msra.gmra.mxu1 %v237_v18 }
  0x95   : > { %v277_v19 = vpop.f32.mrf.mxu0 }
  0xb0   : > { %v297_v20 = vpop.f32.mrf.mxu1 }
  0xb1   : > { %v298_v21 = vadd.f32 %v297_v20, %v277_v19 }
  0xb3   : > { %v301_v22 = vsel %vm300_vm1, %v298_v21, 0.0 }
  0xb4   : > { %302 = vadd.xlane.f32.xlu0 %v301_v22 }
 0x127   : > { %v303_v23 = vpop.xlane.xlu0 %302 }
 0x128   : > { %v304_v24 = vmul.f32 0.03125, %v303_v23 }
 0x12a   : > { %v305_v25 = vsub.f32 %v298_v21, %v304_v24 }
 0x12c   : > { %v306_v26 = vmul.f32 %v305_v25, %v305_v25 }
 0x12e   : > { %v307_v27 = vsel %vm300_vm1, %v306_v26, 0.0 }
 0x12f   : > { %308 = vadd.xlane.f32.xlu0 %v307_v27 }
 0x1a2   : > { %v309_v28 = vpop.xlane.xlu0 %308 }
 0x1a3   : > { %v310_v29 = vmul.f32 0.03125, %v309_v28 }
 0x1a5   : > { %v311_v30 = vadd.f32 1e-12, %v310_v29 }
 0x1a7   : > { %467 = vrsqrt.f32 %v311_v30  ;;  %vm318_vm3 = vweird.f32 %v311_v30 }
 0x1ad   : > { %v468_v31 = vpop.eup %467 }
 0x1ae   : > { %v313_v32 = vmul.f32 %v468_v31, %v311_v30  ;;  %vm319_vm2 = vweird.f32 %v468_v31 }
 0x1af   : > { %vm320_vm4 = vmor %vm318_vm3, %vm319_vm2 }
 0x1b0   : > { %v314_v33 = vmul.f32 %v468_v31, %v313_v32 }
 0x1b2   : > { %v315_v34 = vmul.f32 0.5, %v314_v33 }
 0x1b4   : > { %v316_v35 = vsub.f32 1.5, %v315_v34 }
 0x1b6   : > { %v317_v37 = vmul.f32 %v468_v31, %v316_v35 }
 0x1b8   : > { %v321_v39 = vsel %vm320_vm4, %v468_v31, %v317_v37 }
 0x1b9   : > { %v322_v40 = vmul.f32 %v321_v39, %v305_v25 }
 0x1bb   : > { %v325_v42 = vmul.f32 %v324_v38, %v322_v40 }
 0x1bd   : > { %v327_v43 = vadd.f32 %v326_v41, %v325_v42 }
 0x1bf   : > { %328 = vst.msk [vmem:[%s228_s9] sm:$0xff] %vm300_vm1, %v327_v43 }
 0x1c0   : > { %496 = shalt.err (!%p493_p3)
}
 0x1c1   : > { %428 = dma.vmem_to_hbm [thread:$0]  (%p601_p5), %s343_s10, 128, %s345_s12, %s330_s22  }
 0x1c2 PF: > { %p434_p4 = scmp.ge.s32.totalorder %s531_s21, 2  ;;  %s356_s11 = sand.u32 1, %s519_s18  }
 0x1c3   : > { %s357_s26 = scalar_lea.sflag [#allocation3], %s356_s11 }
 0x1c4   : > { %p431_p7 = pnand %p434_p4, %p605_p6 }
 0x1c6   : > { %p432_p8 = pneg %p431_p7 }
 0x1c8   : > { %514 = dma.done.wait (%p432_p8), %s357_s26, 128  }
 0x1c9   : > { %516 = vsyncadd (%p432_p8), %s357_s26, 4294967168  ;;  %p15_p9 = scmp.ge.s32.totalorder %s588_s24, 4   ;;  %s723_s18 = smov %s523_s19 }
 0x1ca   : > { %s724_s19 = smov %s527_s20  ;;  %s725_s20 = smov %s599_s27 }
 0x1cb   : > { %s726_s21 = smov %s588_s24  ;;  %17 = sbr.rel (!%p15_p9) target bundleno = 3 (0x3), region = 78 }
 0x1d0   :  { %363 = vsyncpa [#allocation3], 1 }
 0x1d1   :  { %365 = vsyncpa [#allocation3 + $0x1], 1 }

</bundles_post_ra>
